<compile_context>
chip_gen: v5e
topology: v5e:2x2
jax: 0.10.0
libtpu: 0.0.40
codegen_flags: <defaults>
</compile_context>

<pallas_src>
import numpy as np
import jax
import jax.numpy as jnp
from jax.experimental import pallas as pl
from jax.experimental.pallas import tpu as pltpu

BATCH, CH, H, W = 2, 4, 16, 16          # small example state shape
FEATURES = CH * H * W                   # 1024 -> lane-dense (multiple of 128)
TILE_F = 256                            # feature tile (multiple of 128)


def _identity_kernel(x_ref, o_ref):
    # encode(x) = x and decode(z) = z; the fused forward is a plain copy of
    # the current (B, TILE_F) VMEM block.
    o_ref[...] = x_ref[...]


def auto_encoder_linear_forward(x):
    """forward(x) = decode(encode(x)) = x, executed as one Pallas kernel."""
    orig_shape = x.shape
    b = orig_shape[0]
    x2d = x.reshape(b, -1)               # channel-major flatten, same as torch
    f = x2d.shape[1]
    assert f % TILE_F == 0, (f, TILE_F)

    out2d = pl.pallas_call(
        _identity_kernel,
        out_shape=jax.ShapeDtypeStruct((b, f), x2d.dtype),
        grid_spec=pltpu.PrefetchScalarGridSpec(
            num_scalar_prefetch=0,
            grid=(f // TILE_F,),
            in_specs=[pl.BlockSpec((b, TILE_F), lambda j: (0, j))],
            out_specs=pl.BlockSpec((b, TILE_F), lambda j: (0, j)),
        ),
        compiler_params=pltpu.CompilerParams(
            # Independent feature tiles -> megacore sharding on v7x.
            dimension_semantics=("parallel",),
            # Working set is a few KiB; leave headroom (v7x: 64 MiB physical).
            vmem_limit_bytes=8 * 1024 * 1024,
        ),
    )(x2d)
    return out2d.reshape(orig_shape)


if __name__ == "__main__":
    key = jax.random.PRNGKey(0)
    x = jax.random.normal(key, (BATCH, CH, H, W), dtype=jnp.float32)

    out = auto_encoder_linear_forward(x)
    out = jax.block_until_ready(out)

    assert out.shape == x.shape, out.shape
    # Reference: AutoEncoderLinear.forward is exactly the identity.
    np.testing.assert_allclose(np.asarray(out), np.asarray(x), rtol=0.0, atol=0.0)

    print("KERNEL_OK")
</pallas_src>

<mosaic_0001>
module attributes {stable_mosaic.version = 11 : i64} {
  func.func @_identity_kernel(%arg0: i32, %arg1: memref<2x256xf32, #tpu.memory_space<vmem>>, %arg2: memref<2x256xf32, #tpu.memory_space<vmem>>) attributes {dimension_semantics = [#tpu.dimension_semantics<parallel>], iteration_bounds = array<i64: 4>, scalar_prefetch = 0 : i64, scratch_operands = 0 : i64, tpu.core_type = #tpu.core_type<tc>, window_params = [{transform_indices = @transform_0, window_bounds = array<i64: 2, 256>}, {transform_indices = @transform_1, window_bounds = array<i64: 2, 256>}]} {
    %c0 = arith.constant 0 : index
    %c0_0 = arith.constant 0 : index
    %0 = vector.load %arg1[%c0, %c0_0] : memref<2x256xf32, #tpu.memory_space<vmem>>, vector<2x256xf32>
    %c0_1 = arith.constant 0 : index
    %c0_2 = arith.constant 0 : index
    %1 = vector.load %arg2[%c0_1, %c0_2] : memref<2x256xf32, #tpu.memory_space<vmem>>, vector<2x256xf32>
    tpu.vector_store %arg2[%c0_1, %c0_2], %0 {strides = array<i32>} : memref<2x256xf32, #tpu.memory_space<vmem>>, vector<2x256xf32>,
    return
  }
  func.func @transform_0(%arg0: i32) -> (i32, i32) {
    %c0_i32 = arith.constant 0 : i32
    %c0_i32_0 = arith.constant 0 : i32
    return %c0_i32, %arg0 : i32, i32
  }
  func.func @transform_1(%arg0: i32) -> (i32, i32) {
    %c0_i32 = arith.constant 0 : i32
    %c0_i32_0 = arith.constant 0 : i32
    return %c0_i32, %arg0 : i32, i32
  }
}

</mosaic_0001>

<bundles_post_ra>
// kernel: tpu_custom_call.1
= control target key start
LH: loop header
LB: loop body
LE: loop exit
PB: predicated region body
PF: predicated region fallthrough
CT: control target
= control target key end

     0   :  { %6 = vsyncpa [#allocation3], 0  ;;  %s521_s0 = inlined_call_operand.hbm [shape: f32[2,1024], index: 0, kind: input, shape index: {}]   ;;  %s522_s1 = inlined_call_operand.hbm [shape: f32[2,1024], index: 1, kind: output, shape index: {}]  }
   0x1   :  { %8 = vsyncpa [#allocation3 + $0x1], 0 }
   0x2   :  { %9 = vsyncpa [#allocation4], 0 }
   0x3   :  { %11 = vsyncpa [#allocation4 + $0x1], 0  ;;  %s396_s6 = smov 0   ;;  %s398_s7 = smov 0  }
   0x4   :  { %s400_s8 = smov 0   ;;  %s402_s9 = smov 0  }
   0x5 LB: > { %s417_s10 = sadd.s32 4294967295, %s384_s9   ;;  %s226_s11 = sadd.s32 4294967294, %s384_s9   ;;  %s384_s9 = sphi %s402_s9, %s531_s9   ;;  %s380_s8 = sphi %s400_s8, %s530_s8   ;;  %s376_s7 = sphi %s398_s7, %s529_s7   ;;  %s372_s6 = sphi %s396_s6, %s528_s6  }
   0x6   : > { %s421_s12 = sadd.s32 1, %s384_s9   ;;  %s24_s13 = sadd.s32 1, %s380_s8 }
   0x7   : > { %s21_s14 = ssub.s32 %s384_s9, %s421_s12  ;;  %p31_p0 = scmp.ne.s32.totalorder %s380_s8, %s376_s7 }
   0x8   : > { %p22_p1 = scmp.eq.s32.totalorder %s21_s14, 0  ;;  %p32_p2 = scmp.eq.s32.totalorder %s384_s9, 0 }
   0x9   : > { %p37_p3 = scmp.ne.s32.totalorder %s376_s7, %s372_s6  ;;  %p38_p4 = scmp.eq.s32.totalorder %s417_s10, 0 }
   0xa   : > { %s433_s15 = scalar_select %p22_p1, %s380_s8, %s24_s13  }
   0xb   : > { %p435_p5 = por %p32_p2, %p31_p0  ;;  %p439_p6 = por %p38_p4, %p37_p3 }
   0xc   : > { %p61_p7 = scmp.eq.s32.totalorder %s417_s10, 3  ;;  %p67_p8 = scmp.eq.s32.totalorder %s226_s11, 3 }
   0xd   : > { %p254_p9 = scmp.lt.s32.totalorder %s384_s9, 4  ;;  %s87_s20 = sand.u32 1, %s380_s8  }
   0xe   : > { %p445_p10 = por %p61_p7, %p31_p0  ;;  %p449_p11 = por %p67_p8, %p37_p3 }
   0xf   : > { %s240_s21 = sshll.u32 %s384_s9, 2  ;;  %s229_s22 = sshll.u32 %s87_s20, 2 }
  0x10   : > { %s96_s25 = scalar_lea.hbm %s521_s0, %s240_s21  ;;  %s91_s27 = scalar_lea.vmem [#allocation2], %s229_s22 }
  0x11   : > { %s98_s26 = sshll.u32 %s96_s25, 4  ;;  %s100_s28 = sshll.u32 %s91_s27, 4  ;;  %s99_s26 = int_to_ptr.hbm [resolvable:$true] %s98_s26  ;;  %s101_s28 = int_to_ptr.vmem [resolvable:$true] %s100_s28 }
  0x12   : > { %p460_p12 = pnand %p254_p9, %p435_p5  ;;  %p232_p13 = scmp.ge.s32.totalorder %s384_s9, 1 }
  0x13   : > { %p105_p0 = scmp.lt.s32.totalorder %s384_s9, 5  ;;  %s88_s30 = scalar_lea.sflag [#allocation3], %s87_s20 }
  0x14   : > { %s288_s2 = sshra.s32 %s99_s26, 4  ;;  %p292_p2 = pneg %p460_p12  ;;  %s289_s2 = int_to_ptr.hbm [resolvable:$true] %s288_s2 }
  0x15   : > { %s290_s3 = scalar_lea.hbm %s289_s2, 4  ;;  %s295_s11 = scalar_lea.hbm %s521_s0, 16 }
  0x16   : > { %p291_p1 = scmp.ne.s32.totalorder %s289_s2, %s290_s3  ;;  %p296_p5 = scmp.lt.s32.totalorder %s289_s2, %s521_s0 }
  0x17   : > { %p297_p7 = scmp.lt.s32.totalorder %s295_s11, %s290_s3 }
  0x18   : > { %p293_p3 = pnand %p292_p2, %p291_p1 }
  0x19   : > { %p298_p8 = por %p297_p7, %p296_p5 }
  0x1a   : > { %p294_p4 = pneg %p293_p3 }
  0x1c   : > { %p299_p9 = pnand %p298_p8, %p294_p4 }
  0x1e   : > { %302 = shalt.err (!%p299_p9)
}
  0x1f   : > { %249 = dma.hbm_to_vmem [thread:$0]  (!%p460_p12), %s99_s26, 64, %s101_s28, %s88_s30  }
  0x20   : > { %p106_p1 = pnand %p232_p13, %p105_p0 }
  0x21   : > { %s481_s16 = sand.u32 (!%p106_p1), 1, %s376_s7  }
  0x22   : > { %109 = sbr.rel (%p106_p1) target bundleno = 55 (0x37), region = 24  ;;  %s233_s20 = sshll.u32 (!%p106_p1), %s481_s16, 2 }
  0x23   : > { %s112_s21 = scalar_lea.sflag (!%p106_p1), [#allocation3], %s481_s16  ;;  %s115_s22 = scalar_lea.vmem (!%p106_p1), [#allocation2], %s233_s20 }
  0x27   : > { %363 = dma.done.wait (%p439_p6), %s112_s21, 64  }
  0x28   : > { %365 = vsyncadd (%p439_p6), %s112_s21, 4294967232  ;;  %s241_s23 = sshll.u32 %s417_s10, 2  ;;  %s134_s27 = scalar_lea.vmem [#allocation5], %s233_s20  ;;  %v137_v0 = vld [vmem:[%s115_s22] sm:$0xf] }
  0x29   : > { %s151_s26 = scalar_lea.hbm %s522_s1, %s241_s23  ;;  %s153_s28 = sshll.u32 %s134_s27, 4  ;;  %138 = vst [vmem:[%s134_s27] sm:$0xf] %v137_v0  ;;  %s154_s28 = int_to_ptr.vmem [resolvable:$true] %s153_s28 }
  0x2a   : > { %s155_s29 = sshll.u32 %s151_s26, 4  ;;  %s140_s30 = scalar_lea.sflag [#allocation4], %s481_s16  ;;  %s156_s29 = int_to_ptr.hbm [resolvable:$true] %s155_s29 }
  0x2b   : > { %s332_s2 = sshra.s32 %s156_s29, 4  ;;  %s338_s4 = scalar_lea.hbm %s522_s1, 16  ;;  %s333_s2 = int_to_ptr.hbm [resolvable:$true] %s332_s2 }
  0x2c   : > { %s334_s17 = scalar_lea.hbm %s333_s2, 4  ;;  %p339_p0 = scmp.lt.s32.totalorder %s333_s2, %s522_s1 }
  0x2d   : > { %p335_p6 = scmp.ne.s32.totalorder %s333_s2, %s334_s17  ;;  %p340_p2 = scmp.lt.s32.totalorder %s338_s4, %s334_s17 }
  0x2f   : > { %p336_p12 = pnand %p335_p6, %p445_p10  ;;  %p341_p3 = por %p340_p2, %p339_p0 }
  0x31   : > { %p337_p13 = pneg %p336_p12 }
  0x33   : > { %p342_p4 = pnand %p341_p3, %p337_p13 }
  0x35   : > { %345 = shalt.err (!%p342_p4)
}
  0x36   : > { %244 = dma.vmem_to_hbm [thread:$0]  (%p445_p10), %s154_s28, 64, %s156_s29, %s140_s30  }
  0x37 PF: > { %p255_p5 = scmp.ge.s32.totalorder %s384_s9, 2  ;;  %s167_s13 = sand.u32 1, %s372_s6  }
  0x38   : > { %s168_s14 = scalar_lea.sflag [#allocation4], %s167_s13 }
  0x39   : > { %p251_p7 = pnand %p255_p5, %p449_p11 }
  0x3b   : > { %p252_p8 = pneg %p251_p7 }
  0x3d   : > { %367 = dma.done.wait (%p252_p8), %s168_s14, 64  }
  0x3e   : > { %369 = vsyncadd (%p252_p8), %s168_s14, 4294967232  ;;  %p14_p9 = scmp.ge.s32.totalorder %s421_s12, 6   ;;  %s528_s6 = smov %s376_s7 }
  0x3f   : > { %s529_s7 = smov %s380_s8  ;;  %s530_s8 = smov %s433_s15 }
  0x40   : > { %s531_s9 = smov %s421_s12  ;;  %16 = sbr.rel (!%p14_p9) target bundleno = 5 (0x5), region = 69 }
  0x45   :  { %174 = vsyncpa [#allocation3], 1 }
  0x46   :  { %176 = vsyncpa [#allocation3 + $0x1], 1 }
  0x47   :  { %177 = vsyncpa [#allocation4], 1 }
  0x48   :  { %179 = vsyncpa [#allocation4 + $0x1], 1 }

</bundles_post_ra>
